<compile_context>
chip_gen: v6e
topology: v6e:2x2x1
jax: 0.10.0
libtpu: 0.0.40
codegen_flags: <defaults>
</compile_context>

<pallas_src>
import math
import functools

import jax
import jax.numpy as jnp
from jax import lax
from jax.experimental import pallas as pl
from jax.experimental.pallas import tpu as pltpu


def _mha_fused_kernel(q_ref, k_ref, v_ref,
                      wq_ref, bq_ref, wk_ref, bk_ref, wv_ref, bv_ref,
                      wo_ref, bo_ref, o_ref, *, heads, dk, dv, scale):
    """One query tile: fused all-head QKV projection + attention + out-proj."""
    q = q_ref[...]                     # (tq, D)
    k = k_ref[...]                     # (m, D)
    v = v_ref[...]                     # (m, D)

    # Fused (all-heads) projections -> lane-dense (tq, H*dk), (m, H*dk), (m, H*dv).
    qh = jnp.dot(q, wq_ref[...], preferred_element_type=jnp.float32) + bq_ref[...]
    kh = jnp.dot(k, wk_ref[...], preferred_element_type=jnp.float32) + bk_ref[...]
    vh = jnp.dot(v, wv_ref[...], preferred_element_type=jnp.float32) + bv_ref[...]

    wo = wo_ref[...]                   # (H*dv, D)
    tq = q.shape[0]
    D = wo.shape[1]

    acc = jnp.zeros((tq, D), jnp.float32)
    for h in range(heads):             # static unroll over heads
        qh_h = qh[:, h * dk:(h + 1) * dk]          # (tq, dk)
        kh_h = kh[:, h * dk:(h + 1) * dk]          # (m, dk)
        vh_h = vh[:, h * dv:(h + 1) * dv]          # (m, dv)

        # QK^T without an explicit transpose: contract last dims on the MXU.
        s = lax.dot_general(qh_h, kh_h, (((1,), (1,)), ((), ())),
                            preferred_element_type=jnp.float32) * scale  # (tq, m)

        mx = jnp.max(s, axis=1, keepdims=True)
        e = jnp.exp(s - mx)
        inv_denom = pl.reciprocal(jnp.sum(e, axis=1, keepdims=True), approx=True)
        p = e * inv_denom                                            # softmax dim=1

        ho = jnp.dot(p, vh_h, preferred_element_type=jnp.float32)    # (tq, dv)

        # Fused output projection: accumulate this head's contribution.
        acc = acc + jnp.dot(ho, wo[h * dv:(h + 1) * dv, :],
                            preferred_element_type=jnp.float32)      # (tq, D)

    o_ref[...] = acc + bo_ref[...]


def pack_params(params, *, heads, dk, dv):
    """One-time packing: stack per-head PyTorch-layout Linear weights into
    lane-dense (D, H*dk)/(D, H*dv) matrices and pre-transpose the out-proj."""
    D = heads * dk
    return {
        # params["wq"]: (H, dk, D) with PyTorch (out,in) layout per head.
        "wq": jnp.transpose(params["wq"], (2, 0, 1)).reshape(D, heads * dk),
        "bq": params["bq"].reshape(1, heads * dk),
        "wk": jnp.transpose(params["wk"], (2, 0, 1)).reshape(D, heads * dk),
        "bk": params["bk"].reshape(1, heads * dk),
        "wv": jnp.transpose(params["wv"], (2, 0, 1)).reshape(D, heads * dv),
        "bv": params["bv"].reshape(1, heads * dv),
        "wo": params["wo"].T,                       # (H*dv, D)
        "bo": params["bo"].reshape(1, D),
    }


def multi_head_attention(queries, keys, values, packed, *, heads, dk, dv, tq=None):
    n, D = queries.shape
    m = keys.shape[0]
    assert D == heads * dk
    hdk, hdv = heads * dk, heads * dv

    if tq is None:
        tq = n if n <= 128 else 128
    assert n % tq == 0
    grid = (n // tq,)

    kernel = functools.partial(_mha_fused_kernel, heads=heads, dk=dk, dv=dv,
                               scale=1.0 / math.sqrt(dk))

    # NOTE: K/V and all weights use constant index_maps (never re-fetched across
    # the q-tile grid); at toy scale the default double-buffering is harmless.
    return pl.pallas_call(
        kernel,
        out_shape=jax.ShapeDtypeStruct((n, D), jnp.float32),
        grid=grid,
        in_specs=[
            pl.BlockSpec((tq, D), lambda i: (i, 0)),    # q tile
            pl.BlockSpec((m, D), lambda i: (0, 0)),     # full K
            pl.BlockSpec((m, D), lambda i: (0, 0)),     # full V
            pl.BlockSpec((D, hdk), lambda i: (0, 0)),   # Wq_all
            pl.BlockSpec((1, hdk), lambda i: (0, 0)),   # bq_all
            pl.BlockSpec((D, hdk), lambda i: (0, 0)),   # Wk_all
            pl.BlockSpec((1, hdk), lambda i: (0, 0)),   # bk_all
            pl.BlockSpec((D, hdv), lambda i: (0, 0)),   # Wv_all
            pl.BlockSpec((1, hdv), lambda i: (0, 0)),   # bv_all
            pl.BlockSpec((hdv, D), lambda i: (0, 0)),   # Wo^T
            pl.BlockSpec((1, D), lambda i: (0, 0)),     # bo
        ],
        out_specs=pl.BlockSpec((tq, D), lambda i: (i, 0)),   # lane-dense (tq, D)
        compiler_params=pltpu.CompilerParams(
            dimension_semantics=("parallel",),
            vmem_limit_bytes=32 * 1024 * 1024),
    )(queries, keys, values,
      packed["wq"], packed["bq"], packed["wk"], packed["bk"],
      packed["wv"], packed["bv"], packed["wo"], packed["bo"])


def init_params(key, heads, dk, dv):
    """Deterministic init mimicking nn.Linear default (uniform +-1/sqrt(fan_in))."""
    D = heads * dk
    ks = jax.random.split(key, 8)
    bnd = 1.0 / math.sqrt(D)
    u = lambda k, shape: jax.random.uniform(k, shape, jnp.float32, -bnd, bnd)
    return {
        "wq": u(ks[0], (heads, dk, D)), "bq": u(ks[1], (heads, dk)),
        "wk": u(ks[2], (heads, dk, D)), "bk": u(ks[3], (heads, dk)),
        "wv": u(ks[4], (heads, dv, D)), "bv": u(ks[5], (heads, dv)),
        "wo": u(ks[6], (D, D)),         "bo": u(ks[7], (D,)),
    }


def reference(queries, keys, values, params, *, heads, dk, dv):
    """Plain-JAX reference matching the PyTorch forward (masked=False)."""
    outs = []
    for h in range(heads):
        qh = queries @ params["wq"][h].T + params["bq"][h]
        kh = keys @ params["wk"][h].T + params["bk"][h]
        vh = values @ params["wv"][h].T + params["bv"][h]
        s = qh @ kh.T / math.sqrt(dk)
        p = jax.nn.softmax(s, axis=1)
        outs.append(p @ vh)
    concat = jnp.concatenate(outs, axis=1)
    return concat @ params["wo"].T + params["bo"]


if __name__ == "__main__":
    heads, dk, dv = 4, 8, 8            # model_dimension = 32
    D = heads * dk
    n, m = 8, 8

    key = jax.random.PRNGKey(0)
    kq, kk, kv, kp = jax.random.split(key, 4)
    queries = jax.random.normal(kq, (n, D), jnp.float32)
    keys = jax.random.normal(kk, (m, D), jnp.float32)
    values = jax.random.normal(kv, (m, D), jnp.float32)
    params = init_params(kp, heads, dk, dv)

    packed = pack_params(params, heads=heads, dk=dk, dv=dv)   # one-time packing
    out = multi_head_attention(queries, keys, values, packed,
                               heads=heads, dk=dk, dv=dv)
    out = jax.block_until_ready(out)

    ref = reference(queries, keys, values, params, heads=heads, dk=dk, dv=dv)
    assert out.shape == (n, D)
    # Slightly relaxed tolerance because of the EUP approximate reciprocal in
    # the softmax denominator.
    assert jnp.allclose(out, ref, atol=2e-3, rtol=2e-3), "mismatch vs reference"
    print("KERNEL_OK")
</pallas_src>

<mosaic_0001>
module attributes {stable_mosaic.version = 11 : i64} {
  func.func @_mha_fused_kernel(%arg0: i32, %arg1: memref<8x32xf32, #tpu.memory_space<vmem>>, %arg2: memref<8x32xf32, #tpu.memory_space<vmem>>, %arg3: memref<8x32xf32, #tpu.memory_space<vmem>>, %arg4: memref<32x32xf32, #tpu.memory_space<vmem>>, %arg5: memref<1x32xf32, #tpu.memory_space<vmem>>, %arg6: memref<32x32xf32, #tpu.memory_space<vmem>>, %arg7: memref<1x32xf32, #tpu.memory_space<vmem>>, %arg8: memref<32x32xf32, #tpu.memory_space<vmem>>, %arg9: memref<1x32xf32, #tpu.memory_space<vmem>>, %arg10: memref<32x32xf32, #tpu.memory_space<vmem>>, %arg11: memref<1x32xf32, #tpu.memory_space<vmem>>, %arg12: memref<8x32xf32, #tpu.memory_space<vmem>>) attributes {dimension_semantics = [#tpu.dimension_semantics<parallel>], iteration_bounds = array<i64: 1>, scalar_prefetch = 0 : i64, scratch_operands = 0 : i64, tpu.core_type = #tpu.core_type<tc>, window_params = [{transform_indices = @transform_0, window_bounds = array<i64: 8, 32>}, {pipeline_mode = #tpu.pipeline_mode<synchronous>, transform_indices = @transform_1, window_bounds = array<i64: 8, 32>}, {pipeline_mode = #tpu.pipeline_mode<synchronous>, transform_indices = @transform_2, window_bounds = array<i64: 8, 32>}, {pipeline_mode = #tpu.pipeline_mode<synchronous>, transform_indices = @transform_3, window_bounds = array<i64: 32, 32>}, {pipeline_mode = #tpu.pipeline_mode<synchronous>, transform_indices = @transform_4, window_bounds = array<i64: 1, 32>}, {pipeline_mode = #tpu.pipeline_mode<synchronous>, transform_indices = @transform_5, window_bounds = array<i64: 32, 32>}, {pipeline_mode = #tpu.pipeline_mode<synchronous>, transform_indices = @transform_6, window_bounds = array<i64: 1, 32>}, {pipeline_mode = #tpu.pipeline_mode<synchronous>, transform_indices = @transform_7, window_bounds = array<i64: 32, 32>}, {pipeline_mode = #tpu.pipeline_mode<synchronous>, transform_indices = @transform_8, window_bounds = array<i64: 1, 32>}, {pipeline_mode = #tpu.pipeline_mode<synchronous>, transform_indices = @transform_9, window_bounds = array<i64: 32, 32>}, {pipeline_mode = #tpu.pipeline_mode<synchronous>, transform_indices = @transform_10, window_bounds = array<i64: 1, 32>}, {transform_indices = @transform_11, window_bounds = array<i64: 8, 32>}]} {
    %c0 = arith.constant 0 : index
    %c0_0 = arith.constant 0 : index
    %0 = vector.load %arg1[%c0, %c0_0] : memref<8x32xf32, #tpu.memory_space<vmem>>, vector<8x32xf32>
    %c0_1 = arith.constant 0 : index
    %c0_2 = arith.constant 0 : index
    %1 = vector.load %arg2[%c0_1, %c0_2] : memref<8x32xf32, #tpu.memory_space<vmem>>, vector<8x32xf32>
    %c0_3 = arith.constant 0 : index
    %c0_4 = arith.constant 0 : index
    %2 = vector.load %arg3[%c0_3, %c0_4] : memref<8x32xf32, #tpu.memory_space<vmem>>, vector<8x32xf32>
    %c0_5 = arith.constant 0 : index
    %c0_6 = arith.constant 0 : index
    %3 = vector.load %arg4[%c0_5, %c0_6] : memref<32x32xf32, #tpu.memory_space<vmem>>, vector<32x32xf32>
    %cst = arith.constant dense<0.000000e+00> : vector<8x32xf32>
    %4 = tpu.matmul %0, %3, %cst {dimension_numbers = #tpu.dot_dimension_numbers<[1], [0], [0], [1], [0, 0, 1, 1], [], []>} : vector<8x32xf32>, vector<32x32xf32>, vector<8x32xf32> -> vector<8x32xf32>
    %c0_7 = arith.constant 0 : index
    %c0_8 = arith.constant 0 : index
    %5 = vector.load %arg5[%c0_7, %c0_8] : memref<1x32xf32, #tpu.memory_space<vmem>>, vector<1x32xf32>
    %6 = vector.broadcast %5 : vector<1x32xf32> to vector<8x32xf32>
    %7 = arith.addf %4, %6 : vector<8x32xf32>
    %c0_9 = arith.constant 0 : index
    %c0_10 = arith.constant 0 : index
    %8 = vector.load %arg6[%c0_9, %c0_10] : memref<32x32xf32, #tpu.memory_space<vmem>>, vector<32x32xf32>
    %cst_11 = arith.constant dense<0.000000e+00> : vector<8x32xf32>
    %9 = tpu.matmul %1, %8, %cst_11 {dimension_numbers = #tpu.dot_dimension_numbers<[1], [0], [0], [1], [0, 0, 1, 1], [], []>} : vector<8x32xf32>, vector<32x32xf32>, vector<8x32xf32> -> vector<8x32xf32>
    %c0_12 = arith.constant 0 : index
    %c0_13 = arith.constant 0 : index
    %10 = vector.load %arg7[%c0_12, %c0_13] : memref<1x32xf32, #tpu.memory_space<vmem>>, vector<1x32xf32>
    %11 = vector.broadcast %10 : vector<1x32xf32> to vector<8x32xf32>
    %12 = arith.addf %9, %11 : vector<8x32xf32>
    %c0_14 = arith.constant 0 : index
    %c0_15 = arith.constant 0 : index
    %13 = vector.load %arg8[%c0_14, %c0_15] : memref<32x32xf32, #tpu.memory_space<vmem>>, vector<32x32xf32>
    %cst_16 = arith.constant dense<0.000000e+00> : vector<8x32xf32>
    %14 = tpu.matmul %2, %13, %cst_16 {dimension_numbers = #tpu.dot_dimension_numbers<[1], [0], [0], [1], [0, 0, 1, 1], [], []>} : vector<8x32xf32>, vector<32x32xf32>, vector<8x32xf32> -> vector<8x32xf32>
    %c0_17 = arith.constant 0 : index
    %c0_18 = arith.constant 0 : index
    %15 = vector.load %arg9[%c0_17, %c0_18] : memref<1x32xf32, #tpu.memory_space<vmem>>, vector<1x32xf32>
    %16 = vector.broadcast %15 : vector<1x32xf32> to vector<8x32xf32>
    %17 = arith.addf %14, %16 : vector<8x32xf32>
    %c0_19 = arith.constant 0 : index
    %c0_20 = arith.constant 0 : index
    %18 = vector.load %arg10[%c0_19, %c0_20] : memref<32x32xf32, #tpu.memory_space<vmem>>, vector<32x32xf32>
    %cst_21 = arith.constant 0.000000e+00 : f32
    %19 = vector.broadcast %cst_21 : f32 to vector<8x32xf32>
    %20 = vector.extract_strided_slice %7 {offsets = [0, 0], sizes = [8, 8], strides = [1, 1]} : vector<8x32xf32> to vector<8x8xf32>
    %21 = vector.extract_strided_slice %12 {offsets = [0, 0], sizes = [8, 8], strides = [1, 1]} : vector<8x32xf32> to vector<8x8xf32>
    %22 = vector.extract_strided_slice %17 {offsets = [0, 0], sizes = [8, 8], strides = [1, 1]} : vector<8x32xf32> to vector<8x8xf32>
    %cst_22 = arith.constant dense<0.000000e+00> : vector<8x8xf32>
    %23 = tpu.matmul %20, %21, %cst_22 {dimension_numbers = #tpu.dot_dimension_numbers<[1], [1], [0], [0], [0, 0, 1, 0], [], []>} : vector<8x8xf32>, vector<8x8xf32>, vector<8x8xf32> -> vector<8x8xf32>
    %cst_23 = arith.constant 0.353553385 : f32
    %24 = vector.broadcast %cst_23 : f32 to vector<8x8xf32>
    %25 = arith.mulf %23, %24 : vector<8x8xf32>
    %cst_24 = arith.constant dense<0xFF800000> : vector<8xf32>
    %26 = vector.multi_reduction <maximumf>, %25, %cst_24 [1] : vector<8x8xf32> to vector<8xf32>
    %27 = vector.shape_cast %26 : vector<8xf32> to vector<8x1xf32>
    %28 = vector.broadcast %27 : vector<8x1xf32> to vector<8x8xf32>
    %29 = arith.subf %25, %28 : vector<8x8xf32>
    %30 = math.exp %29 : vector<8x8xf32>
    %cst_25 = arith.constant dense<0.000000e+00> : vector<8xf32>
    %31 = vector.multi_reduction <add>, %30, %cst_25 [1] : vector<8x8xf32> to vector<8xf32>
    %32 = vector.shape_cast %31 : vector<8xf32> to vector<8x1xf32>
    %33 = tpu.reciprocal %32 {approx = true} : vector<8x1xf32> -> vector<8x1xf32>
    %34 = vector.broadcast %33 : vector<8x1xf32> to vector<8x8xf32>
    %35 = arith.mulf %30, %34 : vector<8x8xf32>
    %cst_26 = arith.constant dense<0.000000e+00> : vector<8x8xf32>
    %36 = tpu.matmul %35, %22, %cst_26 {dimension_numbers = #tpu.dot_dimension_numbers<[1], [0], [0], [1], [0, 0, 1, 1], [], []>} : vector<8x8xf32>, vector<8x8xf32>, vector<8x8xf32> -> vector<8x8xf32>
    %37 = vector.extract_strided_slice %18 {offsets = [0, 0], sizes = [8, 32], strides = [1, 1]} : vector<32x32xf32> to vector<8x32xf32>
    %cst_27 = arith.constant dense<0.000000e+00> : vector<8x32xf32>
    %38 = tpu.matmul %36, %37, %cst_27 {dimension_numbers = #tpu.dot_dimension_numbers<[1], [0], [0], [1], [0, 0, 1, 1], [], []>} : vector<8x8xf32>, vector<8x32xf32>, vector<8x32xf32> -> vector<8x32xf32>
    %39 = arith.addf %19, %38 : vector<8x32xf32>
    %40 = vector.extract_strided_slice %7 {offsets = [0, 8], sizes = [8, 8], strides = [1, 1]} : vector<8x32xf32> to vector<8x8xf32>
    %41 = vector.extract_strided_slice %12 {offsets = [0, 8], sizes = [8, 8], strides = [1, 1]} : vector<8x32xf32> to vector<8x8xf32>
    %42 = vector.extract_strided_slice %17 {offsets = [0, 8], sizes = [8, 8], strides = [1, 1]} : vector<8x32xf32> to vector<8x8xf32>
    %cst_28 = arith.constant dense<0.000000e+00> : vector<8x8xf32>
    %43 = tpu.matmul %40, %41, %cst_28 {dimension_numbers = #tpu.dot_dimension_numbers<[1], [1], [0], [0], [0, 0, 1, 0], [], []>} : vector<8x8xf32>, vector<8x8xf32>, vector<8x8xf32> -> vector<8x8xf32>
    %cst_29 = arith.constant 0.353553385 : f32
    %44 = vector.broadcast %cst_29 : f32 to vector<8x8xf32>
    %45 = arith.mulf %43, %44 : vector<8x8xf32>
    %cst_30 = arith.constant dense<0xFF800000> : vector<8xf32>
    %46 = vector.multi_reduction <maximumf>, %45, %cst_30 [1] : vector<8x8xf32> to vector<8xf32>
    %47 = vector.shape_cast %46 : vector<8xf32> to vector<8x1xf32>
    %48 = vector.broadcast %47 : vector<8x1xf32> to vector<8x8xf32>
    %49 = arith.subf %45, %48 : vector<8x8xf32>
    %50 = math.exp %49 : vector<8x8xf32>
    %cst_31 = arith.constant dense<0.000000e+00> : vector<8xf32>
    %51 = vector.multi_reduction <add>, %50, %cst_31 [1] : vector<8x8xf32> to vector<8xf32>
    %52 = vector.shape_cast %51 : vector<8xf32> to vector<8x1xf32>
    %53 = tpu.reciprocal %52 {approx = true} : vector<8x1xf32> -> vector<8x1xf32>
    %54 = vector.broadcast %53 : vector<8x1xf32> to vector<8x8xf32>
    %55 = arith.mulf %50, %54 : vector<8x8xf32>
    %cst_32 = arith.constant dense<0.000000e+00> : vector<8x8xf32>
    %56 = tpu.matmul %55, %42, %cst_32 {dimension_numbers = #tpu.dot_dimension_numbers<[1], [0], [0], [1], [0, 0, 1, 1], [], []>} : vector<8x8xf32>, vector<8x8xf32>, vector<8x8xf32> -> vector<8x8xf32>
    %57 = vector.extract_strided_slice %18 {offsets = [8, 0], sizes = [8, 32], strides = [1, 1]} : vector<32x32xf32> to vector<8x32xf32>
    %cst_33 = arith.constant dense<0.000000e+00> : vector<8x32xf32>
    %58 = tpu.matmul %56, %57, %cst_33 {dimension_numbers = #tpu.dot_dimension_numbers<[1], [0], [0], [1], [0, 0, 1, 1], [], []>} : vector<8x8xf32>, vector<8x32xf32>, vector<8x32xf32> -> vector<8x32xf32>
    %59 = arith.addf %39, %58 : vector<8x32xf32>
    %60 = vector.extract_strided_slice %7 {offsets = [0, 16], sizes = [8, 8], strides = [1, 1]} : vector<8x32xf32> to vector<8x8xf32>
    %61 = vector.extract_strided_slice %12 {offsets = [0, 16], sizes = [8, 8], strides = [1, 1]} : vector<8x32xf32> to vector<8x8xf32>
    %62 = vector.extract_strided_slice %17 {offsets = [0, 16], sizes = [8, 8], strides = [1, 1]} : vector<8x32xf32> to vector<8x8xf32>
    %cst_34 = arith.constant dense<0.000000e+00> : vector<8x8xf32>
    %63 = tpu.matmul %60, %61, %cst_34 {dimension_numbers = #tpu.dot_dimension_numbers<[1], [1], [0], [0], [0, 0, 1, 0], [], []>} : vector<8x8xf32>, vector<8x8xf32>, vector<8x8xf32> -> vector<8x8xf32>
    %cst_35 = arith.constant 0.353553385 : f32
    %64 = vector.broadcast %cst_35 : f32 to vector<8x8xf32>
    %65 = arith.mulf %63, %64 : vector<8x8xf32>
    %cst_36 = arith.constant dense<0xFF800000> : vector<8xf32>
    %66 = vector.multi_reduction <maximumf>, %65, %cst_36 [1] : vector<8x8xf32> to vector<8xf32>
    %67 = vector.shape_cast %66 : vector<8xf32> to vector<8x1xf32>
    %68 = vector.broadcast %67 : vector<8x1xf32> to vector<8x8xf32>
    %69 = arith.subf %65, %68 : vector<8x8xf32>
    %70 = math.exp %69 : vector<8x8xf32>
    %cst_37 = arith.constant dense<0.000000e+00> : vector<8xf32>
    %71 = vector.multi_reduction <add>, %70, %cst_37 [1] : vector<8x8xf32> to vector<8xf32>
    %72 = vector.shape_cast %71 : vector<8xf32> to vector<8x1xf32>
    %73 = tpu.reciprocal %72 {approx = true} : vector<8x1xf32> -> vector<8x1xf32>
    %74 = vector.broadcast %73 : vector<8x1xf32> to vector<8x8xf32>
    %75 = arith.mulf %70, %74 : vector<8x8xf32>
    %cst_38 = arith.constant dense<0.000000e+00> : vector<8x8xf32>
    %76 = tpu.matmul %75, %62, %cst_38 {dimension_numbers = #tpu.dot_dimension_numbers<[1], [0], [0], [1], [0, 0, 1, 1], [], []>} : vector<8x8xf32>, vector<8x8xf32>, vector<8x8xf32> -> vector<8x8xf32>
    %77 = vector.extract_strided_slice %18 {offsets = [16, 0], sizes = [8, 32], strides = [1, 1]} : vector<32x32xf32> to vector<8x32xf32>
    %cst_39 = arith.constant dense<0.000000e+00> : vector<8x32xf32>
    %78 = tpu.matmul %76, %77, %cst_39 {dimension_numbers = #tpu.dot_dimension_numbers<[1], [0], [0], [1], [0, 0, 1, 1], [], []>} : vector<8x8xf32>, vector<8x32xf32>, vector<8x32xf32> -> vector<8x32xf32>
    %79 = arith.addf %59, %78 : vector<8x32xf32>
    %80 = vector.extract_strided_slice %7 {offsets = [0, 24], sizes = [8, 8], strides = [1, 1]} : vector<8x32xf32> to vector<8x8xf32>
    %81 = vector.extract_strided_slice %12 {offsets = [0, 24], sizes = [8, 8], strides = [1, 1]} : vector<8x32xf32> to vector<8x8xf32>
    %82 = vector.extract_strided_slice %17 {offsets = [0, 24], sizes = [8, 8], strides = [1, 1]} : vector<8x32xf32> to vector<8x8xf32>
    %cst_40 = arith.constant dense<0.000000e+00> : vector<8x8xf32>
    %83 = tpu.matmul %80, %81, %cst_40 {dimension_numbers = #tpu.dot_dimension_numbers<[1], [1], [0], [0], [0, 0, 1, 0], [], []>} : vector<8x8xf32>, vector<8x8xf32>, vector<8x8xf32> -> vector<8x8xf32>
    %cst_41 = arith.constant 0.353553385 : f32
    %84 = vector.broadcast %cst_41 : f32 to vector<8x8xf32>
    %85 = arith.mulf %83, %84 : vector<8x8xf32>
    %cst_42 = arith.constant dense<0xFF800000> : vector<8xf32>
    %86 = vector.multi_reduction <maximumf>, %85, %cst_42 [1] : vector<8x8xf32> to vector<8xf32>
    %87 = vector.shape_cast %86 : vector<8xf32> to vector<8x1xf32>
    %88 = vector.broadcast %87 : vector<8x1xf32> to vector<8x8xf32>
    %89 = arith.subf %85, %88 : vector<8x8xf32>
    %90 = math.exp %89 : vector<8x8xf32>
    %cst_43 = arith.constant dense<0.000000e+00> : vector<8xf32>
    %91 = vector.multi_reduction <add>, %90, %cst_43 [1] : vector<8x8xf32> to vector<8xf32>
    %92 = vector.shape_cast %91 : vector<8xf32> to vector<8x1xf32>
    %93 = tpu.reciprocal %92 {approx = true} : vector<8x1xf32> -> vector<8x1xf32>
    %94 = vector.broadcast %93 : vector<8x1xf32> to vector<8x8xf32>
    %95 = arith.mulf %90, %94 : vector<8x8xf32>
    %cst_44 = arith.constant dense<0.000000e+00> : vector<8x8xf32>
    %96 = tpu.matmul %95, %82, %cst_44 {dimension_numbers = #tpu.dot_dimension_numbers<[1], [0], [0], [1], [0, 0, 1, 1], [], []>} : vector<8x8xf32>, vector<8x8xf32>, vector<8x8xf32> -> vector<8x8xf32>
    %97 = vector.extract_strided_slice %18 {offsets = [24, 0], sizes = [8, 32], strides = [1, 1]} : vector<32x32xf32> to vector<8x32xf32>
    %cst_45 = arith.constant dense<0.000000e+00> : vector<8x32xf32>
    %98 = tpu.matmul %96, %97, %cst_45 {dimension_numbers = #tpu.dot_dimension_numbers<[1], [0], [0], [1], [0, 0, 1, 1], [], []>} : vector<8x8xf32>, vector<8x32xf32>, vector<8x32xf32> -> vector<8x32xf32>
    %99 = arith.addf %79, %98 : vector<8x32xf32>
    %c0_46 = arith.constant 0 : index
    %c0_47 = arith.constant 0 : index
    %100 = vector.load %arg11[%c0_46, %c0_47] : memref<1x32xf32, #tpu.memory_space<vmem>>, vector<1x32xf32>
    %101 = vector.broadcast %100 : vector<1x32xf32> to vector<8x32xf32>
    %102 = arith.addf %99, %101 : vector<8x32xf32>
    %c0_48 = arith.constant 0 : index
    %c0_49 = arith.constant 0 : index
    %103 = vector.load %arg12[%c0_48, %c0_49] : memref<8x32xf32, #tpu.memory_space<vmem>>, vector<8x32xf32>
    tpu.vector_store %arg12[%c0_48, %c0_49], %102 {strides = array<i32>} : memref<8x32xf32, #tpu.memory_space<vmem>>, vector<8x32xf32>,
    return
  }
  func.func @transform_0(%arg0: i32) -> (i32, i32) {
    %c0_i32 = arith.constant 0 : i32
    %c0_i32_0 = arith.constant 0 : i32
    return %arg0, %c0_i32 : i32, i32
  }
  func.func @transform_1(%arg0: i32) -> (i32, i32) {
    %c0_i32 = arith.constant 0 : i32
    %c0_i32_0 = arith.constant 0 : i32
    %c0_i32_1 = arith.constant 0 : i32
    return %c0_i32, %c0_i32_0 : i32, i32
  }
  func.func @transform_2(%arg0: i32) -> (i32, i32) {
    %c0_i32 = arith.constant 0 : i32
    %c0_i32_0 = arith.constant 0 : i32
    %c0_i32_1 = arith.constant 0 : i32
    return %c0_i32, %c0_i32_0 : i32, i32
  }
  func.func @transform_3(%arg0: i32) -> (i32, i32) {
    %c0_i32 = arith.constant 0 : i32
    %c0_i32_0 = arith.constant 0 : i32
    %c0_i32_1 = arith.constant 0 : i32
    return %c0_i32, %c0_i32_0 : i32, i32
  }
  func.func @transform_4(%arg0: i32) -> (i32, i32) {
    %c0_i32 = arith.constant 0 : i32
    %c0_i32_0 = arith.constant 0 : i32
    %c0_i32_1 = arith.constant 0 : i32
    return %c0_i32, %c0_i32_0 : i32, i32
  }
  func.func @transform_5(%arg0: i32) -> (i32, i32) {
    %c0_i32 = arith.constant 0 : i32
    %c0_i32_0 = arith.constant 0 : i32
    %c0_i32_1 = arith.constant 0 : i32
    return %c0_i32, %c0_i32_0 : i32, i32
  }
  func.func @transform_6(%arg0: i32) -> (i32, i32) {
    %c0_i32 = arith.constant 0 : i32
    %c0_i32_0 = arith.constant 0 : i32
    %c0_i32_1 = arith.constant 0 : i32
    return %c0_i32, %c0_i32_0 : i32, i32
  }
  func.func @transform_7(%arg0: i32) -> (i32, i32) {
    %c0_i32 = arith.constant 0 : i32
    %c0_i32_0 = arith.constant 0 : i32
    %c0_i32_1 = arith.constant 0 : i32
    return %c0_i32, %c0_i32_0 : i32, i32
  }
  func.func @transform_8(%arg0: i32) -> (i32, i32) {
    %c0_i32 = arith.constant 0 : i32
    %c0_i32_0 = arith.constant 0 : i32
    %c0_i32_1 = arith.constant 0 : i32
    return %c0_i32, %c0_i32_0 : i32, i32
  }
  func.func @transform_9(%arg0: i32) -> (i32, i32) {
    %c0_i32 = arith.constant 0 : i32
    %c0_i32_0 = arith.constant 0 : i32
    %c0_i32_1 = arith.constant 0 : i32
    return %c0_i32, %c0_i32_0 : i32, i32
  }
  func.func @transform_10(%arg0: i32) -> (i32, i32) {
    %c0_i32 = arith.constant 0 : i32
    %c0_i32_0 = arith.constant 0 : i32
    %c0_i32_1 = arith.constant 0 : i32
    return %c0_i32, %c0_i32_0 : i32, i32
  }
  func.func @transform_11(%arg0: i32) -> (i32, i32) {
    %c0_i32 = arith.constant 0 : i32
    %c0_i32_0 = arith.constant 0 : i32
    return %arg0, %c0_i32 : i32, i32
  }
}

</mosaic_0001>

<bundles_post_ra>
// kernel: tpu_custom_call.1
= control target key start
LH: loop header
LB: loop body
LE: loop exit
PB: predicated region body
PF: predicated region fallthrough
CT: control target
= control target key end

     0   :  { %16 = vsyncpa [#allocation3], 0  ;;  %s1955_s0 = inlined_call_operand.hbm [shape: f32[8,32], index: 0, kind: input, shape index: {}]   ;;  %s1956_s1 = inlined_call_operand.hbm [shape: f32[8,32], index: 1, kind: input, shape index: {}]   ;;  %s1957_s2 = inlined_call_operand.hbm [shape: f32[8,32], index: 2, kind: input, shape index: {}]   ;;  %s1958_s3 = inlined_call_operand.hbm [shape: f32[32,32], index: 3, kind: input, shape index: {}]   ;;  %s1959_s4 = inlined_call_operand.vmem [shape: f32[1,32], index: 4, kind: input, shape index: {}]   ;;  %s1960_s5 = inlined_call_operand.hbm [shape: f32[32,32], index: 5, kind: input, shape index: {}]   ;;  %s1961_s6 = inlined_call_operand.vmem [shape: f32[1,32], index: 6, kind: input, shape index: {}]   ;;  %s1962_s7 = inlined_call_operand.hbm [shape: f32[32,32], index: 7, kind: input, shape index: {}]   ;;  %s1963_s8 = inlined_call_operand.vmem [shape: f32[1,32], index: 8, kind: input, shape index: {}]   ;;  %s1964_s9 = inlined_call_operand.hbm [shape: f32[32,32], index: 9, kind: input, shape index: {}]   ;;  %s1965_s10 = inlined_call_operand.vmem [shape: f32[1,32], index: 10, kind: input, shape index: {}]   ;;  %s1966_s11 = inlined_call_operand.hbm [shape: f32[8,32], index: 11, kind: output, shape index: {}]  }
   0x1   :  { %17 = vsyncpa [#allocation6], 0 }
   0x2   :  { %18 = vsyncpa [#allocation9], 0 }
   0x3   :  { %19 = vsyncpa [#allocation12], 0 }
   0x4   :  { %20 = vsyncpa [#allocation4], 0  ;;  %s1726_s17 = smov [#allocation5]   ;;  %s1727_s19 = smov [#allocation8]  }
   0x5   :  { %s37_s18 = sshll.u32 %s1726_s17, 4  ;;  %s56_s20 = sshll.u32 %s1727_s19, 4  ;;  %s38_s18 = int_to_ptr.vmem [resolvable:$true] %s37_s18  ;;  %s57_s20 = int_to_ptr.vmem [resolvable:$true] %s56_s20 }
   0x6   :  { %s1564_s21 = scalar_lea.vmem %s38_s18, 128  ;;  %p1569_p1 = scmp.lt.s32.totalorder %s38_s18, %s38_s18 }
   0x7   :  { %p1565_p0 = scmp.ne.s32.totalorder %s38_s18, %s1564_s21  ;;  %p1570_p2 = scmp.lt.s32.totalorder %s1564_s21, %s1564_s21 }
   0x9   :  { %p1571_p3 = por %p1570_p2, %p1569_p1 }
   0xb   :  { %p1572_p4 = pnand %p1571_p3, %p1565_p0 }
   0xd   :  { %1575 = shalt.err (!%p1572_p4)
}
   0xe   :  { %40 = dma.hbm_to_vmem [thread:$0]  %s1956_s1, 128, %s38_s18, [#allocation6]  }
   0xf   :  { %s1584_s24 = scalar_lea.vmem %s57_s20, 512  ;;  %p1589_p6 = scmp.lt.s32.totalorder %s57_s20, %s57_s20 }
  0x10   :  { %p1585_p5 = scmp.ne.s32.totalorder %s57_s20, %s1584_s24  ;;  %p1590_p7 = scmp.lt.s32.totalorder %s1584_s24, %s1584_s24 }
  0x12   :  { %p1591_p8 = por %p1590_p7, %p1589_p6 }
  0x14   :  { %p1592_p9 = pnand %p1591_p8, %p1585_p5 }
  0x16   :  { %1595 = shalt.err (!%p1592_p9)
}
  0x17   :  { %s1728_s25 = smov 128   ;;  %s1729_s26 = smov 8  }
  0x18   :  { %62 = dma.hbm_to_vmem [thread:$0]  %s1958_s3, 512, %s57_s20, [#allocation9], %s1728_s25, %s1728_s25, %s1729_s26  }
  0x19   :  { %s1730_s29 = smov [#allocation11]   ;;  %s1731_s12 = smov [#allocation2]  }
  0x1a   :  { %s84_s30 = sshll.u32 %s1730_s29, 4  ;;  %s27_s1 = sshll.u32 %s1731_s12, 4  ;;  %s85_s30 = int_to_ptr.vmem [resolvable:$true] %s84_s30  ;;  %s28_s1 = int_to_ptr.vmem [resolvable:$true] %s27_s1 }
  0x1b   :  { %s1604_s13 = scalar_lea.vmem %s85_s30, 512  ;;  %p1609_p11 = scmp.lt.s32.totalorder %s85_s30, %s85_s30 }
  0x1c   :  { %p1605_p10 = scmp.ne.s32.totalorder %s85_s30, %s1604_s13  ;;  %p1610_p12 = scmp.lt.s32.totalorder %s1604_s13, %s1604_s13 }
  0x1e   :  { %p1611_p13 = por %p1610_p12, %p1609_p11 }
  0x20   :  { %p1612_p0 = pnand %p1611_p13, %p1605_p10 }
  0x22   :  { %1615 = shalt.err (!%p1612_p0)
}
  0x23   :  { %90 = dma.hbm_to_vmem [thread:$0]  %s1962_s7, 512, %s85_s30, [#allocation12], %s1728_s25, %s1728_s25, %s1729_s26  }
  0x24   :  { %s1624_s3 = scalar_lea.vmem %s28_s1, 128  ;;  %p1629_p2 = scmp.lt.s32.totalorder %s28_s1, %s28_s1 }
  0x25   :  { %p1625_p1 = scmp.ne.s32.totalorder %s28_s1, %s1624_s3  ;;  %p1630_p3 = scmp.lt.s32.totalorder %s1624_s3, %s1624_s3 }
  0x27   :  { %p1631_p4 = por %p1630_p3, %p1629_p2 }
  0x29   :  { %p1632_p5 = pnand %p1631_p4, %p1625_p1 }
  0x2b   :  { %1635 = shalt.err (!%p1632_p5)
}
  0x2c   :  { %30 = dma.hbm_to_vmem [thread:$0]  %s1955_s0, 128, %s28_s1, [#allocation3]  }
  0x2d   :  { %s1732_s18 = smov [#allocation7]   ;;  %s1733_s20 = smov [#allocation10]  }
  0x2e   :  { %s47_s19 = sshll.u32 %s1732_s18, 4  ;;  %s70_s21 = sshll.u32 %s1733_s20, 4  ;;  %s48_s19 = int_to_ptr.vmem [resolvable:$true] %s47_s19  ;;  %s71_s21 = int_to_ptr.vmem [resolvable:$true] %s70_s21 }
  0x2f   :  { %s1644_s22 = scalar_lea.vmem %s48_s19, 128  ;;  %p1649_p7 = scmp.lt.s32.totalorder %s48_s19, %s48_s19 }
  0x30   :  { %p1645_p6 = scmp.ne.s32.totalorder %s48_s19, %s1644_s22  ;;  %p1650_p8 = scmp.lt.s32.totalorder %s1644_s22, %s1644_s22 }
  0x32   :  { %p1651_p9 = por %p1650_p8, %p1649_p7 }
  0x34   :  { %p1652_p10 = pnand %p1651_p9, %p1645_p6 }
  0x36   :  { %1655 = shalt.err (!%p1652_p10)
}
  0x37   :  { %50 = dma.hbm_to_vmem [thread:$0]  %s1957_s2, 128, %s48_s19, [#allocation6]  }
  0x38   :  { %s1664_s24 = scalar_lea.vmem %s71_s21, 512  ;;  %p1669_p12 = scmp.lt.s32.totalorder %s71_s21, %s71_s21 }
  0x39   :  { %p1665_p11 = scmp.ne.s32.totalorder %s71_s21, %s1664_s24  ;;  %p1670_p13 = scmp.lt.s32.totalorder %s1664_s24, %s1664_s24 }
  0x3b   :  { %p1671_p0 = por %p1670_p13, %p1669_p12 }
  0x3d   :  { %p1672_p1 = pnand %p1671_p0, %p1665_p11 }
  0x3f   :  { %1675 = shalt.err (!%p1672_p1)
}
  0x40   :  { %76 = dma.hbm_to_vmem [thread:$0]  %s1960_s5, 512, %s71_s21, [#allocation9], %s1728_s25, %s1728_s25, %s1729_s26  }
  0x41   :  { %s1734_s28 = smov [#allocation13]  }
  0x42   :  { %s98_s29 = sshll.u32 %s1734_s28, 4  ;;  %s99_s29 = int_to_ptr.vmem [resolvable:$true] %s98_s29 }
  0x43   :  { %s1684_s30 = scalar_lea.vmem %s99_s29, 512  ;;  %p1689_p3 = scmp.lt.s32.totalorder %s99_s29, %s99_s29 }
  0x44   :  { %p1685_p2 = scmp.ne.s32.totalorder %s99_s29, %s1684_s30  ;;  %p1690_p4 = scmp.lt.s32.totalorder %s1684_s30, %s1684_s30 }
  0x46   :  { %p1691_p5 = por %p1690_p4, %p1689_p3 }
  0x48   :  { %p1692_p6 = pnand %p1691_p5, %p1685_p2 }
  0x4a   :  { %1695 = shalt.err (!%p1692_p6)
}
  0x4b   :  { %104 = dma.hbm_to_vmem [thread:$0]  %s1964_s9, 512, %s99_s29, [#allocation12], %s1728_s25, %s1728_s25, %s1729_s26  }
  0x4c   :  { %1716 = dma.done.wait [#allocation3], 128  }
  0x4d   :  { %1717 = vsyncadd [#allocation3], 4294967168 }
  0x4e   :  { %1718 = dma.done.wait [#allocation6], 256  }
  0x4f   :  { %1719 = vsyncadd [#allocation6], 4294967040 }
  0x50   :  { %1720 = dma.done.wait [#allocation9], 1024  }
  0x51   :  { %1721 = vsyncadd [#allocation9], 4294966272 }
  0x52   :  { %1722 = dma.done.wait [#allocation12], 1024  }
  0x53   :  { %1723 = vsyncadd [#allocation12], 4294966272  ;;  %v1735_v0 = vmov 0.0   ;;  %vm1736_vm0 = vmmov 0   ;;  %v219_v1 = vld [vmem:[#allocation10 + $0x18] sm:$0xff]  ;;  %v218_v3 = vld [vmem:[#allocation10 + $0x10] sm:$0xff] }
  0x54   :  { %1443 = vmatprep.subr.mxu1 %v1735_v0  ;;  %1432 = vmatprep.subr.mxu0 %v1735_v0  ;;  %v134_v2 = vld [vmem:[#allocation8 + $0x18] sm:$0xff]  ;;  %v133_v4 = vld [vmem:[#allocation8 + $0x10] sm:$0xff]  ;;  %v217_v5 = vld [vmem:[#allocation10 + $0x8] sm:$0xff]  ;;  %vm142_vm1 = vcmask 261120   ;;  %vm388_vm2 = vcmask 64512   ;;  %s1737_s1 = smov 120  }
  0x55   :  { %1451 = vmatprep.mubr.msk.f32.mxu1 %vm1736_vm0, %v1735_v0  ;;  %1440 = vmatprep.mubr.msk.f32.mxu0 %vm1736_vm0, %v1735_v0  ;;  %v132_v6 = vld [vmem:[#allocation8 + $0x8] sm:$0xff]  ;;  %v216_v7 = vld [vmem:[#allocation10] sm:$0xff]  ;;  %v129_v9 = vld [vmem:[#allocation5] sm:$0xff]  ;;  %s1739_s13 = smov 104   ;;  %s1740_s3 = smov [#allocation14]  }
  0x56   :  { %1444 = vmatpush3.msra.mxu1 %v219_v1  ;;  %1433 = vmatpush3.msra.mxu0 %v134_v2  ;;  %v131_v8 = vld [vmem:[#allocation8] sm:$0xff]  ;;  %v128_v10 = vld [vmem:[#allocation2] sm:$0xff]  ;;  %v303_v11 = vld [vmem:[#allocation11 + $0x18] sm:$0xff]  ;;  %s1358_s16 = sshll.u32 %s1740_s3, 4  ;;  %s1359_s16 = int_to_ptr.vmem [resolvable:$true] %s1358_s16 }
  0x57   :  { %1445 = vmatprep.subr.mxu1 %v1735_v0  ;;  %1434 = vmatprep.subr.mxu0 %v1735_v0  ;;  %v302_v12 = vld [vmem:[#allocation11 + $0x10] sm:$0xff]  ;;  %v301_v13 = vld [vmem:[#allocation11 + $0x8] sm:$0xff]  ;;  %v300_v14 = vld [vmem:[#allocation11] sm:$0xff]  ;;  %s1696_s17 = scalar_lea.vmem %s1359_s16, 128  ;;  %p1701_p8 = scmp.lt.s32.totalorder %s1359_s16, %s1359_s16 }
  0x58   :  { %1446 = vmatpush3.msra.mxu1 %v218_v3  ;;  %1435 = vmatpush3.msra.mxu0 %v133_v4  ;;  %v130_v15 = vld [vmem:[#allocation7] sm:$0xff]  ;;  %v1372_v16 = vld [vmem:[%s1961_s6] ss:$0 sm:$0xff]  ;;  %v384_v56 = vld [vmem:[#allocation13] sm:$0xff]  ;;  %p1697_p7 = scmp.ne.s32.totalorder %s1359_s16, %s1696_s17  ;;  %p1702_p9 = scmp.lt.s32.totalorder %s1696_s17, %s1696_s17 }
  0x59   :  { %1447 = vmatprep.subr.mxu1 %v1735_v0  ;;  %1436 = vmatprep.subr.mxu0 %v1735_v0  ;;  %v1370_v17 = vld [vmem:[%s1959_s4] ss:$0 sm:$0xff] }
  0x5a   :  { %1448 = vmatpush3.msra.mxu1 %v217_v5  ;;  %1437 = vmatpush3.msra.mxu0 %v132_v6  ;;  %v1374_v24 = vld [vmem:[%s1963_s8] ss:$0 sm:$0xff]  ;;  %s1738_s8 = smov 112   ;;  %p1703_p10 = por %p1702_p9, %p1701_p8 }
  0x5b   :  { %1449 = vmatprep.subr.mxu1 %v1735_v0  ;;  %1438 = vmatprep.subr.mxu0 %v1735_v0  ;;  %v385_v51 = vld [vmem:[#allocation13 + $0x8] sm:$0xff] }
  0x5c   :  { %1450 = vmatpush3.msra.mxu1 %v216_v7  ;;  %1439 = vmatpush3.msra.mxu0 %v131_v8  ;;  %p1704_p11 = pnand %p1703_p10, %p1697_p7 }
  0x5d   :  { %1452 = vmatmul.mubr.msk.f32.vlgmr.msra.gmra.mxu1 %vm142_vm1, %v129_v9  ;;  %1441 = vmatmul.mubr.msk.f32.vlgmr.msra.gmra.mxu0 %vm142_vm1, %v128_v10 }
  0x5e   :  { %1465 = vmatprep.subr.mxu1 %v1735_v0  ;;  %1467 = vmatprep.mubr.msk.f32.mxu1 %vm1736_vm0, %v1735_v0 }
  0x5f   :  { %1454 = vmatprep.subr.mxu0 %v1735_v0  ;;  %1462 = vmatprep.mubr.msk.f32.mxu0 %vm1736_vm0, %v1735_v0 }
  0x60   :  { %1455 = vmatpush3.msra.mxu0 %v303_v11 }
  0x61   :  { %1456 = vmatprep.subr.mxu0 %v1735_v0 }
  0x62   :  { %1457 = vmatpush3.msra.mxu0 %v302_v12 }
  0x63   :  { %1458 = vmatprep.subr.mxu0 %v1735_v0 }
  0x64   :  { %1459 = vmatpush3.msra.mxu0 %v301_v13 }
  0x65   :  { %1460 = vmatprep.subr.mxu0 %v1735_v0 }
  0x66   :  { %1461 = vmatpush3.msra.mxu0 %v300_v14 }
  0x67   :  { %1463 = vmatmul.mubr.msk.f32.vlgmr.msra.gmra.mxu0 %vm142_vm1, %v130_v15  ;;  %1475 = vmatprep.subr.mxu0 %v1735_v0 }
  0x68   :  { %1477 = vmatprep.mubr.msk.f32.mxu0 %vm1736_vm0, %v1735_v0 }
 0x11d   :  { %v296_v18 = vpop.f32.mrf.mxu1  ;;  %v212_v19 = vpop.f32.mrf.mxu0 }
 0x11e   :  { %v1867_v20 = vadd.f32 %v1372_v16, %v296_v18  ;;  %v1869_v21 = vadd.f32 %v1370_v17, %v212_v19  ;;  %v386_v19 = vld [vmem:[#allocation13 + $0x10] sm:$0xff] }
 0x11f   :  { %v1453_v22 = vpop.f32.mrf.mxu1  ;;  %v1442_v23 = vpop.f32.mrf.mxu0 }
 0x120   :  { %552 = vrot.lane.b32.xlu0 %v1867_v20, %s1737_s1  ;;  %1466 = vmatpush3.xpose.msk.msra.mxu1 %vm388_vm2, %v1867_v20 }
 0x121   :  { %1470 = vmatprep.subr.mxu1 %v1735_v0 }
 0x123   :  { %1468 = vmatmul.mubr.msk.f32.vlgmr.msra.gmra.mxu1 %vm388_vm2, %v1869_v21 }
 0x124   :  { %550 = vrot.lane.b32.xlu0 %v1869_v21, %s1737_s1  ;;  %1472 = vmatprep.mubr.msk.f32.mxu1 %vm1736_vm0, %v1735_v0 }
 0x127   :  { %v380_v25 = vpop.f32.mrf.mxu0 }
 0x128   :  { %v1885_v26 = vadd.f32 %v1374_v24, %v380_v25 }
 0x129   :  { %v1464_v27 = vpop.f32.mrf.mxu0 }
 0x12a   :  { %1471 = vmatpush3.msra.mxu1 %v1885_v26 }
 0x12b   :  { %1480 = vmatprep.subr.mxu1 %v1735_v0 }
 0x192   :  { %v553_v28 = vpop.permute.xlu0 %552 }
 0x193   :  { %1476 = vmatpush3.xpose.msk.msra.mxu0 %vm388_vm2, %v553_v28 }
 0x194   :  { %1485 = vmatprep.subr.mxu0 %v1735_v0 }
 0x196   :  { %v551_v29 = vpop.permute.xlu0 %550 }
 0x197   :  { %1478 = vmatmul.mubr.msk.f32.vlgmr.msra.gmra.mxu0 %vm388_vm2, %v551_v29 }
 0x198   :  { %1487 = vmatprep.mubr.msk.f32.mxu0 %vm1736_vm0, %v1735_v0  ;;  %1486 = vmatpush3.msra.mxu0 %v385_v51 }
 0x199   :  { %1495 = vmatprep.subr.mxu0 %v1735_v0 }
 0x1e3   :  { %v461_v30 = vpop.f32.mrf.mxu1 }
 0x1e4   :  { %v465_v31 = vmul.f32 0.35355338, %v461_v30 }
 0x1e5   :  { %v1469_v32 = vpop.f32.mrf.mxu1 }
 0x1e6   :  { %v466_v33 = vsel %vm388_vm2, %v465_v31, -inf  ;;  %v387_v32 = vld [vmem:[#allocation13 + $0x18] sm:$0xff] }
 0x1e7   :  { %467 = vmax.xlane.f32.xlu1 %v466_v33 }
 0x257   :  { %v624_v34 = vpop.f32.mrf.mxu0 }
 0x258   :  { %v628_v35 = vmul.f32 0.35355338, %v624_v34 }
 0x259   :  { %v1479_v36 = vpop.f32.mrf.mxu0 }
 0x25a   :  { %v629_v37 = vsel %vm388_vm2, %v628_v35, -inf }
 0x25b   :  { %630 = vmax.xlane.f32.xlu1 %v629_v37 }
 0x270   :  { %v468_v38 = vpop.xlane.xlu1 %467 }
 0x271   :  { %v469_v39 = vsub.f32 %v465_v31, %v468_v38 }
 0x273   :  { %v470_v40 = vmul.f32 1.442695, %v469_v39 }
 0x275   :  { %1540 = vpow2.f32 %v470_v40 }
 0x282   :  { %v1541_v41 = vpop.eup %1540 }
 0x283   :  { %v472_v42 = vsel %vm388_vm2, %v1541_v41, 0.0 }
 0x284   :  { %473 = vadd.xlane.f32.xlu0 %v472_v42 }
 0x29a   :  { %953 = vrot.lane.b32.xlu0 %v1885_v26, %s1738_s8 }
 0x2e4   :  { %v631_v43 = vpop.xlane.xlu1 %630 }
 0x2e5   :  { %v632_v44 = vsub.f32 %v628_v35, %v631_v43 }
 0x2e7   :  { %v633_v45 = vmul.f32 1.442695, %v632_v44 }
 0x2e9   :  { %1542 = vpow2.f32 %v633_v45 }
 0x2f6   :  { %v1543_v46 = vpop.eup %1542 }
 0x2f7   :  { %v635_v47 = vsel %vm388_vm2, %v1543_v46, 0.0 }
 0x2f8   :  { %636 = vadd.xlane.f32.xlu1 %v635_v47 }
 0x309   :  { %641 = vrot.lane.b32.xlu1 %v1885_v26, %s1737_s1 }
 0x30d   :  { %v474_v48 = vpop.xlane.xlu0 %473  ;;  %865 = vrot.lane.b32.xlu1 %v1867_v20, %s1738_s8 }
 0x30e   :  { %1544 = vrcp.f32 %v474_v48 }
 0x311   :  { %863 = vrot.lane.b32.xlu1 %v1869_v21, %s1738_s8  ;;  %v954_v58 = vpop.permute.xlu0 %953 }
 0x31b   :  { %v1545_v49 = vpop.eup %1544 }
 0x31c   :  { %v476_v50 = vmul.f32 %v1545_v49, %v1541_v41 }
 0x31e   :  { %1473 = vmatmul.mubr.msk.f32.vlgmr.msra.gmra.mxu1 %vm388_vm2, %v476_v50 }
 0x31f   :  { %1482 = vmatprep.mubr.msk.f32.mxu1 %vm1736_vm0, %v1735_v0 }
 0x381   :  { %v637_v52 = vpop.xlane.xlu1 %636 }
 0x382   :  { %1546 = vrcp.f32 %v637_v52 }
 0x385   :  { %v642_v53 = vpop.permute.xlu1 %641 }
 0x386   :  { %1481 = vmatpush3.msra.mxu1 %v642_v53 }
 0x387   :  { %1490 = vmatprep.subr.mxu1 %v1735_v0 }
 0x389   :  { %v866_v60 = vpop.permute.xlu1 %865 }
 0x38d   :  { %v864_v63 = vpop.permute.xlu1 %863 }
 0x38f   :  { %v1547_v54 = vpop.eup %1546 }
 0x390   :  { %v639_v55 = vmul.f32 %v1547_v54, %v1543_v46 }
 0x392   :  { %1483 = vmatmul.mubr.msk.f32.vlgmr.msra.gmra.mxu1 %vm388_vm2, %v639_v55 }
 0x393   :  { %1491 = vmatpush3.msra.mxu1 %v384_v56  ;;  %1492 = vmatprep.mubr.msk.f32.mxu1 %vm1736_vm0, %v1735_v0 }
 0x394   :  { %1500 = vmatprep.subr.mxu1 %v1735_v0 }
 0x3de   :  { %v546_v57 = vpop.f32.mrf.mxu1 }
 0x3df   :  { %1493 = vmatmul.mubr.msk.f32.vlgmr.msra.gmra.mxu1 %vm388_vm2, %v546_v57 }
 0x3e0   :  { %1501 = vmatpush3.msra.mxu1 %v954_v58  ;;  %v1474_v59 = vpop.f32.mrf.mxu1  ;;  %1502 = vmatprep.mubr.msk.f32.mxu1 %vm1736_vm0, %v1735_v0 }
 0x3e1   :  { %1510 = vmatprep.subr.mxu1 %v1735_v0 }
 0x452   :  { %v713_v61 = vpop.f32.mrf.mxu1 }
 0x453   :  { %1488 = vmatmul.mubr.msk.f32.vlgmr.msra.gmra.mxu0 %vm388_vm2, %v713_v61 }
 0x454   :  { %1496 = vmatpush3.xpose.msk.msra.mxu0 %vm388_vm2, %v866_v60  ;;  %v1484_v62 = vpop.f32.mrf.mxu1  ;;  %1497 = vmatprep.mubr.msk.f32.mxu0 %vm1736_vm0, %v1735_v0 }
 0x455   :  { %1505 = vmatprep.subr.mxu0 %v1735_v0 }
 0x457   :  { %1498 = vmatmul.mubr.msk.f32.vlgmr.msra.gmra.mxu0 %vm388_vm2, %v864_v63 }
 0x458   :  { %1507 = vmatprep.mubr.msk.f32.mxu0 %vm1736_vm0, %v1735_v0  ;;  %1506 = vmatpush3.msra.mxu0 %v386_v19 }
 0x459   :  { %1515 = vmatprep.subr.mxu0 %v1735_v0 }
 0x49f   :  { %v859_v1 = vpop.f32.mrf.mxu1 }
 0x4a1   :  { %v1494_v2 = vpop.f32.mrf.mxu1 }
 0x513   :  { %v786_v3 = vpop.f32.mrf.mxu0 }
 0x514   :  { %v860_v33 = vadd.f32 %v859_v1, %v786_v3 }
 0x515   :  { %v1489_v4 = vpop.f32.mrf.mxu0 }
 0x517   :  { %v937_v5 = vpop.f32.mrf.mxu0 }
 0x518   :  { %v941_v6 = vmul.f32 0.35355338, %v937_v5 }
 0x519   :  { %v1499_v7 = vpop.f32.mrf.mxu0 }
 0x51a   :  { %v942_v8 = vsel %vm388_vm2, %v941_v6, -inf }
 0x51b   :  { %943 = vmax.xlane.f32.xlu1 %v942_v8 }
 0x5a4   :  { %v944_v9 = vpop.xlane.xlu1 %943 }
 0x5a5   :  { %v945_v10 = vsub.f32 %v941_v6, %v944_v9 }
 0x5a7   :  { %v946_v11 = vmul.f32 1.442695, %v945_v10 }
 0x5a9   :  { %1548 = vpow2.f32 %v946_v11 }
 0x5b6   :  { %v1549_v12 = vpop.eup %1548 }
 0x5b7   :  { %v948_v13 = vsel %vm388_vm2, %v1549_v12, 0.0 }
 0x5b8   :  { %949 = vadd.xlane.f32.xlu0 %v948_v13 }
 0x5ce   :  { %1105 = vrot.lane.b32.xlu0 %v1867_v20, %s1739_s13 }
 0x5d2   :  { %1103 = vrot.lane.b32.xlu0 %v1869_v21, %s1739_s13 }
 0x641   :  { %v950_v14 = vpop.xlane.xlu0 %949 }
 0x642   :  { %1550 = vrcp.f32 %v950_v14 }
 0x645   :  { %v1106_v16 = vpop.permute.xlu0 %1105 }
 0x649   :  { %v1104_v18 = vpop.permute.xlu0 %1103 }
 0x64f   :  { %v1551_v15 = vpop.eup %1550 }
 0x650   :  { %v952_v17 = vmul.f32 %v1551_v15, %v1549_v12 }
 0x652   :  { %1503 = vmatmul.mubr.msk.f32.vlgmr.msra.gmra.mxu1 %vm388_vm2, %v952_v17 }
 0x653   :  { %1511 = vmatpush3.xpose.msk.msra.mxu1 %vm388_vm2, %v1106_v16  ;;  %1512 = vmatprep.mubr.msk.f32.mxu1 %vm1736_vm0, %v1735_v0 }
 0x654   :  { %1520 = vmatprep.subr.mxu1 %v1735_v0 }
 0x656   :  { %1513 = vmatmul.mubr.msk.f32.vlgmr.msra.gmra.mxu1 %vm388_vm2, %v1104_v18 }
 0x657   :  { %1522 = vmatprep.mubr.msk.f32.mxu1 %vm1736_vm0, %v1735_v0  ;;  %1521 = vmatpush3.msra.mxu1 %v387_v32 }
 0x712   :  { %v1025_v20 = vpop.f32.mrf.mxu1 }
 0x713   :  { %1508 = vmatmul.mubr.msk.f32.vlgmr.msra.gmra.mxu0 %vm388_vm2, %v1025_v20 }
 0x714   :  { %v1504_v21 = vpop.f32.mrf.mxu1  ;;  %1517 = vmatprep.mubr.msk.f32.mxu0 %vm1736_vm0, %v1735_v0 }
 0x716   :  { %v1177_v22 = vpop.f32.mrf.mxu1 }
 0x717   :  { %v1181_v23 = vmul.f32 0.35355338, %v1177_v22 }
 0x718   :  { %v1514_v24 = vpop.f32.mrf.mxu1 }
 0x719   :  { %v1182_v25 = vsel %vm388_vm2, %v1181_v23, -inf }
 0x71a   :  { %1183 = vmax.xlane.f32.xlu0 %v1182_v25 }
 0x7a3   :  { %v1184_v27 = vpop.xlane.xlu0 %1183 }
 0x7a4   :  { %v1185_v28 = vsub.f32 %v1181_v23, %v1184_v27 }
 0x7a6   :  { %v1186_v29 = vmul.f32 1.442695, %v1185_v28 }
 0x7a8   :  { %1552 = vpow2.f32 %v1186_v29 }
 0x7b5   :  { %v1553_v30 = vpop.eup %1552 }
 0x7b6   :  { %v1188_v31 = vsel %vm388_vm2, %v1553_v30, 0.0 }
 0x7b7   :  { %1189 = vadd.xlane.f32.xlu1 %v1188_v31 }
 0x7c8   :  { %1193 = vrot.lane.b32.xlu1 %v1885_v26, %s1739_s13  ;;  %v1392_v26 = vld [vmem:[%s1965_s10] ss:$0 sm:$0xff] }
 0x7d3   :  { %v1098_v0 = vpop.f32.mrf.mxu0 }
 0x7d4   :  { %v1102_v34 = vadd.f32 %v1098_v0, %v860_v33 }
 0x7d5   :  { %v1509_v35 = vpop.f32.mrf.mxu0 }
 0x840   :  { %v1190_v36 = vpop.xlane.xlu1 %1189 }
 0x841   :  { %1554 = vrcp.f32 %v1190_v36 }
 0x844   :  { %v1194_v37 = vpop.permute.xlu1 %1193 }
 0x845   :  { %1516 = vmatpush3.msra.mxu0 %v1194_v37 }
 0x84e   :  { %v1555_v38 = vpop.eup %1554 }
 0x84f   :  { %v1192_v39 = vmul.f32 %v1555_v38, %v1553_v30 }
 0x851   :  { %1518 = vmatmul.mubr.msk.f32.vlgmr.msra.gmra.mxu0 %vm388_vm2, %v1192_v39 }
 0x911   :  { %v1265_v40 = vpop.f32.mrf.mxu0 }
 0x912   :  { %1523 = vmatmul.mubr.msk.f32.vlgmr.msra.gmra.mxu1 %vm388_vm2, %v1265_v40 }
 0x913   :  { %v1519_v41 = vpop.f32.mrf.mxu0 }
 0x9d2   :  { %v1338_v42 = vpop.f32.mrf.mxu1 }
 0x9d3   :  { %v1342_v43 = vadd.f32 %v1338_v42, %v1102_v34 }
 0x9d4   :  { %v1524_v44 = vpop.f32.mrf.mxu1 }
 0x9d5   :  { %v1350_v45 = vadd.f32 %v1392_v26, %v1342_v43 }
 0x9d7   :  { %1351 = vst.msk [vmem:[#allocation14] sm:$0xff] %vm142_vm1, %v1350_v45 }
 0x9d8   :  { %1707 = shalt.err (!%p1704_p11)
}
 0x9d9   :  { %1361 = dma.vmem_to_hbm [thread:$0]  %s1359_s16, 128, %s1966_s11, [#allocation4]  }
 0x9da   :  { %1724 = dma.done.wait [#allocation4], 128  }
 0x9db   :  { %1725 = vsyncadd [#allocation4], 4294967168 }
 0x9dc   :  { %1365 = vsyncpa [#allocation3], 1 }
 0x9dd   :  { %1366 = vsyncpa [#allocation6], 1 }
 0x9de   :  { %1367 = vsyncpa [#allocation9], 1 }
 0x9df   :  { %1368 = vsyncpa [#allocation12], 1 }
 0x9e0   :  { %1369 = vsyncpa [#allocation4], 1 }

</bundles_post_ra>
